<compile_context>
chip_gen: v7x
topology: tpu7x:2x2x1
jax: 0.10.0
libtpu: 0.0.40
codegen_flags: <defaults>
</compile_context>

<pallas_src>
import math
from functools import partial

import jax
import jax.numpy as jnp
import numpy as np
from jax import lax
from jax.experimental import pallas as pl
from jax.experimental.pallas import tpu as pltpu


def _relpos_bias_kernel(emb_t_ref, out_ref, *, tile_n, chunk, seq_j,
                        num_buckets, max_distance):
    """One grid step: bias for flattened (q,k) lanes [g*tile_n, (g+1)*tile_n)."""
    num_chunks = tile_n // chunk
    base = pl.program_id(0) * tile_n

    # ---- hoisted, chunk-invariant values (built exactly once per grid step) --
    local_col = lax.broadcasted_iota(jnp.int32, (1, chunk), 1)
    # Packed 16-bit one-hot compare: bucket values < num_buckets (<=31) are
    # exact in bf16; native bf16 VALUs on v6e/v7x process 2x elems per vreg.
    # TODO(synk): on v5e (no bf16 VPU) an int32 compare path is marginally better.
    bucket_ids = lax.broadcasted_iota(
        jnp.int32, (num_buckets, chunk), 0).astype(jnp.bfloat16)
    emb_t = emb_t_ref[...]                                # (heads, nb) bf16

    max_exact = num_buckets // 2
    # log(n/max_exact)/log(max_distance/max_exact)*(nb-max_exact) == log(n)*c1+c2
    c1 = (num_buckets - max_exact) / math.log(max_distance / max_exact)
    c2 = -math.log(max_exact) * c1
    is_pow2 = (seq_j & (seq_j - 1)) == 0
    shift = seq_j.bit_length() - 1

    def compute_chunk(c):
        idx = local_col + (base + c * chunk)              # global flattened index
        if is_pow2:                                       # shift/mask, no int div
            q_pos = idx >> shift
            k_pos = idx & (seq_j - 1)
        else:                                             # constant-divisor divide
            q_pos = idx // seq_j
            k_pos = idx - q_pos * seq_j
        # _relative_position_bucket (mirrors the PyTorch staticmethod).
        n = jnp.maximum(q_pos - k_pos, 0)                 # = max(-(k - q), 0)
        is_small = n < max_exact
        n_f = jnp.maximum(n, 1).astype(jnp.float32)       # guard log(0)
        large = max_exact + (jnp.log(n_f) * c1 + c2).astype(jnp.int32)
        large = jnp.minimum(large, num_buckets - 1)
        bucket = jnp.where(is_small, n, large).astype(jnp.bfloat16)   # (1, chunk)
        # Embedding gather as one-hot matmul on the MXU (bf16 in, f32 accumulate):
        #   emb_t (heads, nb) @ onehot_t (nb, chunk) -> (heads, chunk)
        onehot_t = (bucket_ids == bucket).astype(jnp.bfloat16)
        return jnp.dot(emb_t, onehot_t, preferred_element_type=jnp.float32)

    if num_chunks == 1:
        out_ref[...] = compute_chunk(0).astype(out_ref.dtype)
    else:
        def body(c, carry):
            off = pl.multiple_of(c * chunk, 128)          # aligned, unmasked vst
            out_ref[:, pl.ds(off, chunk)] = compute_chunk(c).astype(out_ref.dtype)
            return carry
        lax.fori_loop(0, num_chunks, body, 0,
                      unroll=num_chunks if num_chunks <= 8 else 8)


def _cdiv(a, b):
    return -(-a // b)


def rel_pos_bias(emb, i, j, *, num_buckets=32, max_distance=128,
                 target_lanes=65536, chunk=2048, out_dtype=jnp.float32):
    """emb: (num_buckets, heads) f32 embedding table.  Returns (heads, i, j)."""
    nb, heads = emb.shape
    assert nb == num_buckets
    assert chunk % 128 == 0

    # Cast the tiny table once, outside the kernel; constant block index keeps
    # it resident in VMEM across all grid steps.
    emb_t = emb.T.astype(jnp.bfloat16)                    # (heads, num_buckets)

    N = i * j
    if N <= chunk:
        # Tiny problem: single tile == full array (no 128 constraint applies),
        # single chunk, no padding.
        tile_n, chunk_eff, n_tiles = N, N, 1
    else:
        chunk_eff = chunk
        # Per-tile output block: ~target_lanes lanes AND <= ~4 MiB (fits v5e's
        # 16 MiB default scoped VMEM with double buffering), both rounded to a
        # multiple of chunk; also keep n_tiles >= 2 so a v7x grid can shard
        # across both TensorCores.
        lane_cap = max(chunk, (target_lanes // chunk) * chunk)
        byte_cap = max(chunk, (((4 << 20) // (heads * 4)) // chunk) * chunk)
        half_n = chunk * _cdiv(N, 2 * chunk)
        tile_n = max(chunk, min(lane_cap, byte_cap, half_n))
        n_tiles = _cdiv(N, tile_n)
    assert tile_n % chunk_eff == 0

    kernel = partial(_relpos_bias_kernel, tile_n=tile_n, chunk=chunk_eff,
                     seq_j=j, num_buckets=num_buckets, max_distance=max_distance)

    out_flat = pl.pallas_call(
        kernel,
        out_shape=jax.ShapeDtypeStruct((heads, N), out_dtype),
        grid=(n_tiles,),
        in_specs=[pl.BlockSpec((heads, num_buckets), lambda g: (0, 0))],
        # Last (partial) block, if any, is masked by Pallas on writeback, so the
        # output needs no padding and no post-kernel slice copy.
        out_specs=pl.BlockSpec((heads, tile_n), lambda g: (0, g)),
        compiler_params=pltpu.CompilerParams(
            dimension_semantics=("parallel",)),
    )(emb_t)

    # Contiguous reshape -> (heads, i, j); matches rearrange(values,'i j h->h i j').
    return out_flat.reshape(heads, i, j)


# ----------------------------- references / checks ---------------------------

def _rel_pos_bias_ref(emb, i, j, *, num_buckets=32, max_distance=128):
    """Pure-JAX reference (mirrors the PyTorch forward)."""
    q_pos = jnp.arange(i, dtype=jnp.int32)
    k_pos = jnp.arange(j, dtype=jnp.int32)
    rel_pos = k_pos[None, :] - q_pos[:, None]
    n = jnp.maximum(-rel_pos, 0)
    max_exact = num_buckets // 2
    is_small = n < max_exact
    n_safe = jnp.maximum(n, 1).astype(jnp.float32)
    val_if_large = max_exact + (
        jnp.log(n_safe / max_exact)
        / math.log(max_distance / max_exact)
        * (num_buckets - max_exact)
    ).astype(jnp.int32)
    val_if_large = jnp.minimum(val_if_large, num_buckets - 1)
    bucket = jnp.where(is_small, n, val_if_large)         # (i, j)
    values = emb[bucket]                                  # (i, j, heads)
    return jnp.transpose(values, (2, 0, 1))               # (heads, i, j)


def _bucket_hoisted(n, num_buckets, max_distance):
    max_exact = num_buckets // 2
    c1 = (num_buckets - max_exact) / math.log(max_distance / max_exact)
    c2 = -math.log(max_exact) * c1
    is_small = n < max_exact
    n_f = jnp.maximum(n, 1).astype(jnp.float32)
    large = max_exact + (jnp.log(n_f) * c1 + c2).astype(jnp.int32)
    large = jnp.minimum(large, num_buckets - 1)
    return jnp.where(is_small, n, large)


def _bucket_ref(n, num_buckets, max_distance):
    max_exact = num_buckets // 2
    is_small = n < max_exact
    n_f = jnp.maximum(n, 1).astype(jnp.float32)
    large = max_exact + (jnp.log(n_f / max_exact) / math.log(max_distance / max_exact)
                         * (num_buckets - max_exact)).astype(jnp.int32)
    large = jnp.minimum(large, num_buckets - 1)
    return jnp.where(is_small, n, large)


if __name__ == "__main__":
    key = jax.random.PRNGKey(0)

    # Exhaustive check of the hoisted-constant bucket formula vs the reference
    # formula over all distances that can occur (clamp region beyond max_dist).
    n_all = jnp.arange(4 * 128, dtype=jnp.int32)
    np.testing.assert_array_equal(
        np.asarray(_bucket_hoisted(n_all, 32, 128)),
        np.asarray(_bucket_ref(n_all, 32, 128)))

    # (heads, num_buckets, max_distance, i, j, target_lanes, chunk)
    configs = [
        (8, 32, 128, 16, 16, 65536, 2048),  # tiny: single tile / chunk, pow2 j
        (8, 32, 128, 40, 24, 65536, 2048),  # non-pow2 j (constant-divisor path)
        (8, 32, 128, 64, 64, 65536, 2048),  # two tiles, one chunk each
        (8, 32, 128, 72, 64, 2048, 512),    # inner chunk loop + partial final block
        (8, 32, 128, 48, 48, 65536, 2048),  # non-pow2 j + partial final block
    ]

    for heads, nb, md, i, j, tl, ck in configs:
        key, sub = jax.random.split(key)
        # nn.Embedding(num_buckets, heads) default init ~ N(0, 1)
        emb = jax.random.normal(sub, (nb, heads), dtype=jnp.float32)

        out = rel_pos_bias(emb, i, j, num_buckets=nb, max_distance=md,
                           target_lanes=tl, chunk=ck)
        out = jax.block_until_ready(out)
        assert out.shape == (heads, i, j)

        # Tight check of bucketing + gather over every (q, k) pair: given the
        # bf16-rounded table the one-hot gather is exact.
        emb_rounded = emb.astype(jnp.bfloat16).astype(jnp.float32)
        ref_exact = _rel_pos_bias_ref(emb_rounded, i, j,
                                      num_buckets=nb, max_distance=md)
        np.testing.assert_allclose(np.asarray(out), np.asarray(ref_exact),
                                   rtol=1e-6, atol=1e-6)

        # Loose check vs. the full-precision reference: only difference is the
        # bf16 rounding of the embedding table (rel. error <= 2^-9).
        ref_full = _rel_pos_bias_ref(emb, i, j, num_buckets=nb, max_distance=md)
        np.testing.assert_allclose(np.asarray(out), np.asarray(ref_full),
                                   rtol=1e-2, atol=1e-3)

    print("KERNEL_OK")
</pallas_src>

<mosaic_0001>
module attributes {stable_mosaic.version = 11 : i64} {
  func.func @_relpos_bias_kernel(%arg0: i32, %arg1: memref<8x32xbf16, #tpu.memory_space<vmem>>, %arg2: memref<8x256xf32, #tpu.memory_space<vmem>>) attributes {dimension_semantics = [#tpu.dimension_semantics<parallel>], iteration_bounds = array<i64: 1>, scalar_prefetch = 0 : i64, scratch_operands = 0 : i64, tpu.core_type = #tpu.core_type<tc>, window_params = [{pipeline_mode = #tpu.pipeline_mode<synchronous>, transform_indices = @transform_0, window_bounds = array<i64: 8, 32>}, {transform_indices = @transform_1, window_bounds = array<i64: 8, 256>}]} {
    %c256_i32 = arith.constant 256 : i32
    %0 = arith.muli %arg0, %c256_i32 : i32
    %1 = tpu.iota {dimensions = array<i32: 1>} : vector<1x256xi32>
    %2 = tpu.iota {dimensions = array<i32: 0>} : vector<32x256xi32>
    %3 = arith.sitofp %2 : vector<32x256xi32> to vector<32x256xbf16>
    %c0 = arith.constant 0 : index
    %c0_0 = arith.constant 0 : index
    %4 = vector.load %arg1[%c0, %c0_0] : memref<8x32xbf16, #tpu.memory_space<vmem>>, vector<8x32xbf16>
    %c0_i32 = arith.constant 0 : i32
    %5 = arith.addi %0, %c0_i32 : i32
    %6 = vector.broadcast %5 : i32 to vector<1x256xi32>
    %7 = arith.addi %1, %6 : vector<1x256xi32>
    %c4_i32 = arith.constant 4 : i32
    %8 = vector.broadcast %c4_i32 : i32 to vector<1x256xi32>
    %9 = arith.shrsi %7, %8 : vector<1x256xi32>
    %c15_i32 = arith.constant 15 : i32
    %10 = vector.broadcast %c15_i32 : i32 to vector<1x256xi32>
    %11 = arith.andi %7, %10 : vector<1x256xi32>
    %12 = arith.subi %9, %11 : vector<1x256xi32>
    %c0_i32_1 = arith.constant 0 : i32
    %13 = vector.broadcast %c0_i32_1 : i32 to vector<1x256xi32>
    %14 = arith.maxsi %12, %13 : vector<1x256xi32>
    %c16_i32 = arith.constant 16 : i32
    %15 = vector.broadcast %c16_i32 : i32 to vector<1x256xi32>
    %16 = arith.cmpi slt, %14, %15 : vector<1x256xi32>
    %c1_i32 = arith.constant 1 : i32
    %17 = vector.broadcast %c1_i32 : i32 to vector<1x256xi32>
    %18 = arith.maxsi %14, %17 : vector<1x256xi32>
    %19 = arith.sitofp %18 : vector<1x256xi32> to vector<1x256xf32>
    %20 = math.log %19 : vector<1x256xf32>
    %cst = arith.constant 7.69437361 : f32
    %21 = vector.broadcast %cst : f32 to vector<1x256xf32>
    %22 = arith.mulf %20, %21 : vector<1x256xf32>
    %cst_2 = arith.constant -21.333334 : f32
    %23 = vector.broadcast %cst_2 : f32 to vector<1x256xf32>
    %24 = arith.addf %22, %23 : vector<1x256xf32>
    %25 = arith.fptosi %24 : vector<1x256xf32> to vector<1x256xi32>
    %c16_i32_3 = arith.constant 16 : i32
    %26 = vector.broadcast %c16_i32_3 : i32 to vector<1x256xi32>
    %27 = arith.addi %26, %25 : vector<1x256xi32>
    %c31_i32 = arith.constant 31 : i32
    %28 = vector.broadcast %c31_i32 : i32 to vector<1x256xi32>
    %29 = arith.minsi %27, %28 : vector<1x256xi32>
    %30 = arith.select %16, %14, %29 : vector<1x256xi1>, vector<1x256xi32>
    %31 = arith.sitofp %30 : vector<1x256xi32> to vector<1x256xbf16>
    %32 = vector.broadcast %31 : vector<1x256xbf16> to vector<32x256xbf16>
    %33 = arith.cmpf oeq, %3, %32 : vector<32x256xbf16>
    %34 = arith.extui %33 : vector<32x256xi1> to vector<32x256xi32>
    %35 = arith.sitofp %34 : vector<32x256xi32> to vector<32x256xf32>
    %36 = arith.truncf %35 : vector<32x256xf32> to vector<32x256xbf16>
    %cst_4 = arith.constant dense<0.000000e+00> : vector<8x256xf32>
    %37 = tpu.matmul %4, %36, %cst_4 {dimension_numbers = #tpu.dot_dimension_numbers<[1], [0], [0], [1], [0, 0, 1, 1], [], []>} : vector<8x32xbf16>, vector<32x256xbf16>, vector<8x256xf32> -> vector<8x256xf32>
    %c0_5 = arith.constant 0 : index
    %c0_6 = arith.constant 0 : index
    %38 = vector.load %arg2[%c0_5, %c0_6] : memref<8x256xf32, #tpu.memory_space<vmem>>, vector<8x256xf32>
    tpu.vector_store %arg2[%c0_5, %c0_6], %37 {strides = array<i32>} : memref<8x256xf32, #tpu.memory_space<vmem>>, vector<8x256xf32>,
    return
  }
  func.func @transform_0(%arg0: i32) -> (i32, i32) {
    %c0_i32 = arith.constant 0 : i32
    %c0_i32_0 = arith.constant 0 : i32
    %c0_i32_1 = arith.constant 0 : i32
    return %c0_i32, %c0_i32_0 : i32, i32
  }
  func.func @transform_1(%arg0: i32) -> (i32, i32) {
    %c0_i32 = arith.constant 0 : i32
    %c0_i32_0 = arith.constant 0 : i32
    return %c0_i32, %arg0 : i32, i32
  }
}

</mosaic_0001>

<bundles_post_ra>
// kernel: tpu_custom_call.1
= control target key start
LH: loop header
LB: loop body
LE: loop exit
PB: predicated region body
PF: predicated region fallthrough
CT: control target
= control target key end

     0   :  { %6 = vsyncpa [#allocation3], 0  ;;  %s337_s0 = inlined_call_operand.hbm [shape: bf16[8,32], index: 0, kind: input, shape index: {}]   ;;  %s338_s1 = inlined_call_operand.hbm [shape: f32[8,256], index: 1, kind: output, shape index: {}]  }
   0x1   :  { %7 = vsyncpa [#allocation4], 0  ;;  %s290_s6 = smov [#allocation2]   ;;  %s242_s10 = scalar_lea.hbm %s337_s0, 64 }
   0x2   :  { %s14_s7 = sshll.u32 %s290_s6, 4  ;;  %p243_p0 = scmp.ne.s32.totalorder %s337_s0, %s242_s10  ;;  %s15_s7 = int_to_ptr.vmem [resolvable:$true] %s14_s7 }
   0x3   :  { %p246_p1 = scmp.lt.u32.totalorder %s242_s10, %s337_s0 }
   0x5   :  { %p248_p2 = pnand %p246_p1, %p243_p0 }
   0x7   :  { %251 = shalt.err (!%p248_p2)
}
   0x8   :  { %s252_s15 = scalar_lea.vmem %s15_s7, 64  ;;  %p257_p4 = scmp.lt.s32.totalorder %s15_s7, %s15_s7 }
   0x9   :  { %p253_p3 = scmp.ne.s32.totalorder %s15_s7, %s252_s15  ;;  %p258_p5 = scmp.lt.s32.totalorder %s252_s15, %s252_s15 }
   0xb   :  { %p259_p6 = por %p258_p5, %p257_p4 }
   0xd   :  { %p260_p7 = pnand %p259_p6, %p253_p3 }
   0xf   :  { %263 = shalt.err (!%p260_p7)
}
  0x10   :  { %17 = dma.hbm_to_vmem [thread:$0]  %s337_s0, 64, %s15_s7, [#allocation3]  }
  0x11   :  { %286 = dma.done.wait [#allocation3], 64  }
  0x12   :  { %287 = vsyncadd [#allocation3], 4294967232  ;;  %v25_v0 = vlaneseq  ;;  %v291_v1 = vmov 0   ;;  %s293_s0 = smov [#allocation5]  }
  0x13   :  { %183 = vmatprep.mubr.bf16.mxu0 %v291_v1  ;;  %s200_s18 = sshll.u32 %s293_s0, 4  ;;  %s201_s18 = int_to_ptr.vmem [resolvable:$true] %s200_s18 }
  0x14   :  { %v26_v2 = vand.u32 127, %v25_v0  ;;  %v29_v20 = vshrl.u32 %v25_v0, 7  ;;  %s264_s19 = scalar_lea.vmem %s201_s18, 256  ;;  %p269_p9 = scmp.lt.s32.totalorder %s201_s18, %s201_s18 }
  0x15   :  { %p265_p8 = scmp.ne.s32.totalorder %s201_s18, %s264_s19  ;;  %p270_p10 = scmp.lt.s32.totalorder %s264_s19, %s264_s19 }
  0x16   :  { %v27_v3 = vadd.s32 128, %v26_v2  ;;  %v43_v4 = vshra.s32 %v26_v2, 4  ;;  %v45_v5 = vand.u32 15, %v26_v2  ;;  %v30_v25 = vadd.s32 8, %v29_v20 }
  0x17   :  { %v31_v28 = vadd.s32 16, %v29_v20  ;;  %v32_v29 = vadd.s32 24, %v29_v20  ;;  %v33_v32 = vcvt.s32.f32 %v29_v20  ;;  %p271_p11 = por %p270_p10, %p269_p9 }
  0x18   :  { %v44_v6 = vshra.s32 %v27_v3, 4  ;;  %v46_v7 = vand.u32 15, %v27_v3  ;;  %v47_v8 = vsub.s32 %v43_v4, %v45_v5  ;;  %v34_v33 = vcvt.s32.f32 %v30_v25 }
  0x19   :  { %v35_v36 = vcvt.s32.f32 %v31_v28  ;;  %v36_v37 = vcvt.s32.f32 %v32_v29  ;;  %v292_v5 = vmov 1.0|1.0   ;;  %p272_p12 = pnand %p271_p11, %p265_p8 }
  0x1a   :  { %v48_v9 = vsub.s32 %v44_v6, %v46_v7  ;;  %vm49_vm0 = vcmp.gt.s32.totalorder %v47_v8, 0  ;;  %v37_v41 = vpack.c.bf16 %v34_v33, %v33_v32 }
  0x1b   :  { %v50_v10 = vsel %vm49_vm0, %v47_v8, 0  ;;  %v38_v44 = vpack.c.bf16 %v36_v37, %v35_v36 }
  0x1c   :  { %vm51_vm1 = vcmp.gt.s32.totalorder %v48_v9, 0  ;;  %vm55_vm2 = vcmp.gt.s32.totalorder %v50_v10, 1  ;;  %vm53_vm4 = vcmp.lt.s32.totalorder %v50_v10, 16 }
  0x1d   :  { %v52_v11 = vsel %vm51_vm1, %v48_v9, 0  ;;  %v56_v12 = vsel %vm55_vm2, %v50_v10, 1 }
  0x1e   :  { %vm57_vm3 = vcmp.gt.s32.totalorder %v52_v11, 1  ;;  %v59_v14 = vcvt.s32.f32 %v56_v12  ;;  %vm54_vm5 = vcmp.lt.s32.totalorder %v52_v11, 16 }
  0x1f   :  { %v58_v13 = vsel %vm57_vm3, %v52_v11, 1 }
  0x20   :  { %v60_v15 = vcvt.s32.f32 %v58_v13  ;;  %238 = vlog2.f32 %v59_v14 }
  0x22   :  { %240 = vlog2.f32 %v60_v15 }
  0x2a   :  { %v239_v16 = vpop.eup %238 }
  0x2b   :  { %v62_v18 = vmul.f32 0.6931472, %v239_v16 }
  0x2c   :  { %v241_v17 = vpop.eup %240 }
  0x2d   :  { %v64_v19 = vmul.f32 0.6931472, %v241_v17  ;;  %v65_v21 = vmul.f32 7.6943736, %v62_v18 }
  0x2f   :  { %v66_v22 = vmul.f32 7.6943736, %v64_v19  ;;  %v67_v23 = vadd.f32 -21.333334, %v65_v21 }
  0x31   :  { %v68_v24 = vadd.f32 -21.333334, %v66_v22  ;;  %v230_v26 = vtrunc.f32 %v67_v23 }
  0x33   :  { %v232_v27 = vtrunc.f32 %v68_v24  ;;  %v231_v30 = vcvt.f32.s32 %v230_v26 }
  0x35   :  { %v233_v31 = vcvt.f32.s32 %v232_v27  ;;  %v71_v34 = vadd.s32 16, %v231_v30 }
  0x37   :  { %v72_v35 = vadd.s32 16, %v233_v31  ;;  %vm73_vm6 = vcmp.lt.s32.totalorder %v71_v34, 31 }
  0x38   :  { %v74_v38 = vsel %vm73_vm6, %v71_v34, 31 }
  0x39   :  { %vm75_vm7 = vcmp.lt.s32.totalorder %v72_v35, 31  ;;  %v77_v40 = vsel %vm53_vm4, %v50_v10, %v74_v38 }
  0x3a   :  { %v76_v39 = vsel %vm75_vm7, %v72_v35, 31  ;;  %v79_v43 = vcvt.s32.f32 %v77_v40 }
  0x3b   :  { %v78_v42 = vsel %vm54_vm5, %v52_v11, %v76_v39 }
  0x3c   :  { %v80_v45 = vcvt.s32.f32 %v78_v42  ;;  %v81_v46 = vpack.c.bf16 %v79_v43, %v79_v43 }
  0x3e   :  { %v82_v47 = vpack.c.bf16 %v80_v45, %v80_v45  ;;  %vm83_vm8 = vcmp.eq.bf16.partialorder %v37_v41, %v81_v46  ;;  %vm85_vm9 = vcmp.eq.bf16.partialorder %v38_v44, %v81_v46 }
  0x3f   :  { %v87_v48 = vsel %vm83_vm8, 65537, %v291_v1  ;;  %v89_v49 = vsel %vm85_vm9, 65537, %v291_v1 }
  0x40   :  { %vm84_vm10 = vcmp.eq.bf16.partialorder %v37_v41, %v82_v47  ;;  %vm86_vm11 = vcmp.eq.bf16.partialorder %v38_v44, %v82_v47 }
  0x41   :  { %v88_v50 = vsel %vm84_vm10, 65537, %v291_v1  ;;  %v90_v51 = vsel %vm86_vm11, 65537, %v291_v1 }
  0x42   :  { %v209_v52 = vcombine.low %v87_v48, %v88_v50  ;;  %v210_v53 = vcombine.high %v87_v48, %v88_v50  ;;  %v211_v54 = vcombine.low %v89_v49, %v90_v51  ;;  %v212_v55 = vcombine.high %v89_v49, %v90_v51 }
  0x44   :  { %vm103_vm12 = vcmp.ne.s16.totalorder %v209_v52, 0  ;;  %vm104_vm13 = vcmp.ne.s16.totalorder %v210_v53, 0  ;;  %vm105_vm14 = vcmp.ne.s16.totalorder %v211_v54, 0  ;;  %vm106_vm15 = vcmp.ne.s16.totalorder %v212_v55, 0 }
  0x45   :  { %v107_v56 = vsel %vm103_vm12, 65537, %v291_v1  ;;  %v108_v57 = vsel %vm104_vm13, 65537, %v291_v1  ;;  %v109_v58 = vsel %vm105_vm14, 65537, %v291_v1  ;;  %v110_v59 = vsel %vm106_vm15, 65537, %v291_v1  ;;  %v39_v1 = vld [vmem:[#allocation2] sm:$0xf] }
  0x46   :  { %v112_v60 = vunpack.c.h.b16 %v107_v56  ;;  %v114_v61 = vunpack.c.h.b16 %v108_v57  ;;  %v111_v62 = vunpack.c.l.b16 %v107_v56  ;;  %v113_v63 = vunpack.c.l.b16 %v108_v57 }
  0x47   :  { %v116_v0 = vunpack.c.h.b16 %v109_v58  ;;  %v118_v2 = vunpack.c.h.b16 %v110_v59  ;;  %v115_v3 = vunpack.c.l.b16 %v109_v58  ;;  %v117_v4 = vunpack.c.l.b16 %v110_v59 }
  0x48   :  { %vm120_vm0 = vcmp.ne.s32.totalorder %v112_v60, 0  ;;  %vm122_vm1 = vcmp.ne.s32.totalorder %v114_v61, 0  ;;  %vm119_vm2 = vcmp.ne.s32.totalorder %v111_v62, 0  ;;  %vm121_vm3 = vcmp.ne.s32.totalorder %v113_v63, 0 }
  0x49   :  { %vm221_vm4 = vmpackc.low %vm122_vm1, %vm120_vm0  ;;  %vm124_vm5 = vcmp.ne.s32.totalorder %v116_v0, 0  ;;  %vm126_vm6 = vcmp.ne.s32.totalorder %v118_v2, 0  ;;  %vm123_vm7 = vcmp.ne.s32.totalorder %v115_v3, 0  ;;  %vm125_vm8 = vcmp.ne.s32.totalorder %v117_v4, 0 }
  0x4a   :  { %222 = vmatprep.subr.msk.bf16.mxu0 %vm221_vm4, %v292_v5  ;;  %vm223_vm9 = vmpackc.low %vm121_vm3, %vm119_vm2  ;;  %vm147_vm12 = vcmask 261120  }
  0x4b   :  { %224 = vmatpush1.bf16.msk.msra.mxu0 %vm223_vm9, %v292_v5  ;;  %vm225_vm10 = vmpackc.low %vm126_vm6, %vm124_vm5 }
  0x4c   :  { %226 = vmatprep.subr.msk.bf16.mxu0 %vm225_vm10, %v292_v5  ;;  %vm227_vm11 = vmpackc.low %vm125_vm8, %vm123_vm7 }
  0x4f   :  { %228 = vmatpush1.bf16.msk.msra.mxu0 %vm227_vm11, %v292_v5 }
  0x52   :  { %229 = vmatmul.mubr.msk.bf16.vlgmr.msra.gmra.mrb[0].mxu0 %vm147_vm12, %v39_v1 }
 0x125   :  { %v185_v6 = vpop.f32.mrb[0].mxu0 }
 0x126   :  { %192 = vst [vmem:[#allocation5] sm:$0xff] %v185_v6  ;;  %v187_v7 = vpop.f32.mrb[1].mxu0 }
 0x127   :  { %193 = vst [vmem:[#allocation5 + $0x8] sm:$0xff] %v187_v7  ;;  %v189_v8 = vpop.f32.mrb[2].mxu0 }
 0x128   :  { %v190_v9 = vpop.f32.mrb[3].mxu0 }
 0x129   :  { %275 = shalt.err (!%p272_p12)
}
 0x12a   :  { %s276_s22 = scalar_lea.hbm %s338_s1, 256 }
 0x12b   :  { %p277_p13 = scmp.ne.s32.totalorder %s338_s1, %s276_s22  ;;  %p280_p0 = scmp.lt.u32.totalorder %s276_s22, %s338_s1 }
 0x12d   :  { %p282_p1 = pnand %p280_p0, %p277_p13 }
 0x12f   :  { %285 = shalt.err (!%p282_p1)
}
 0x130   :  { %203 = dma.vmem_to_hbm [thread:$0]  %s201_s18, 256, %s338_s1, [#allocation4]  }
 0x131   :  { %288 = dma.done.wait [#allocation4], 256  }
 0x132   :  { %289 = vsyncadd [#allocation4], 4294967040 }
 0x133   :  { %207 = vsyncpa [#allocation3], 1 }
 0x134   :  { %208 = vsyncpa [#allocation4], 1 }

</bundles_post_ra>
